<compile_context>
chip_gen: v6e
topology: v6e:2x2x1
jax: 0.10.0
libtpu: 0.0.40
codegen_flags: <defaults>
</compile_context>

<pallas_src>
import functools

import jax
import jax.numpy as jnp
from jax.experimental import pallas as pl
from jax.experimental.pallas import tpu as pltpu


def _round_up(x, m):
    return ((x + m - 1) // m) * m


def _mlp_kernel(final_act, num_layers, matmul_dtype, *refs):
    """Fused MLP forward.

    refs = (x_ref, w0_ref, b0_ref, w1_ref, b1_ref, ..., o_ref)
    Weights are pre-transposed to (in, out) and stored in `matmul_dtype`;
    biases are (1, out) float32; the last layer is lane-padded to a multiple of 128.
    """
    x_ref = refs[0]
    o_ref = refs[-1]
    param_refs = refs[1:-1]

    h = x_ref[...]                                   # already in matmul_dtype (cast once, wrapper-side)
    for i in range(num_layers):
        w = param_refs[2 * i][...]                   # (in, out) in matmul_dtype
        b = param_refs[2 * i + 1][...]               # (1, out) f32
        # MXU matmul with f32 accumulation; bias added to the f32 accumulator.
        h = jnp.dot(h, w, preferred_element_type=jnp.float32) + b
        if i < num_layers - 1:
            h = jnp.maximum(h, 0.0)                  # ReLU between hidden layers
            if h.dtype != matmul_dtype:
                h = h.astype(matmul_dtype)           # keep inter-layer activations in bf16 on the bf16 path

    # final activation (matches torch_NN.fa)
    if final_act == 'affine':
        pass
    elif final_act == 'relu':
        h = jnp.maximum(h, 0.0)
    elif final_act == 'sigmoid':
        h = jax.nn.sigmoid(h)
    elif final_act == 'tanh':
        h = jnp.tanh(h)
    elif final_act == 'exp':
        h = jnp.exp(h)
    else:
        raise NotImplementedError(final_act)

    o_ref[...] = h.astype(o_ref.dtype)


def _prepare_params(weights, biases, matmul_dtype=jnp.float32):
    """Build-time (one-shot): transpose weights to (in, out), bias -> (1, out),
    lane-pad the LAST layer's columns to a multiple of 128 for unmasked output stores."""
    num_layers = len(weights)
    out_dim = int(weights[-1].shape[0])
    padded_out = max(128, _round_up(out_dim, 128))
    params = []
    for i, (w, b) in enumerate(zip(weights, biases)):
        wt = jnp.asarray(w, jnp.float32).T                       # (in, out)
        bb = jnp.asarray(b, jnp.float32).reshape(1, -1)          # (1, out)
        if i == num_layers - 1 and padded_out != out_dim:
            wt = jnp.pad(wt, ((0, 0), (0, padded_out - out_dim)))
            bb = jnp.pad(bb, ((0, 0), (0, padded_out - out_dim)))
        params.append(wt.astype(matmul_dtype))                   # weights in matmul_dtype
        params.append(bb)                                        # bias stays f32
    return tuple(params), out_dim, padded_out


def _vmem_budget_bytes():
    # Generation-aware cap: ~80% of physical per-core VMEM (v5e/v6e: 128 MiB -> ~102 MiB,
    # v7x: 64 MiB -> ~51 MiB), leaving headroom for compiler-internal scratch / spills.
    try:
        cap = int(pltpu.get_tpu_info().vmem_capacity_bytes)
    except Exception:
        cap = 64 * 1024 * 1024
    return int(cap * 0.8)


def _choose_block_batch(batch, inp, max_dim, itemsize):
    # Cap bb when layers are wide so the live f32 activation tile stays modest
    # (avoids accumulator spills through the VMEM store slot).
    if max_dim >= 4096:
        cap = 128
    elif max_dim >= 1024:
        cap = 256
    else:
        cap = 512
    x_bytes = batch * inp * itemsize
    # Use >=2 grid steps when there's enough work: both v7x TensorCores take blocks on the
    # "parallel" axis, and the x-DMA of block i+1 overlaps compute of block i (v5e HBM BW).
    # Tiny problems stay single-block (pure launch-overhead regime, ~0.35 us/step saved).
    want_split = (batch > cap) or (batch >= 256) or (x_bytes > (2 << 20))
    if not want_split:
        return batch
    bb = min(cap, _round_up(pl.cdiv(batch, 2), 8))
    return max(bb, 8)


def _forward_impl(single_buffer_params, final_act, num_layers, matmul_dtype,
                  out_dim, padded_out, block_batch, x, *p):
    batch = x.shape[0]
    inp = int(p[0].shape[0])
    max_dim = max([inp] + [int(q.shape[-1]) for q in p[0::2]])
    itemsize = jnp.dtype(matmul_dtype).itemsize

    if block_batch is not None:
        bb = max(8, _round_up(min(int(block_batch), batch), 8))   # (8,128) rule: multiple of 8
        if bb >= batch:
            bb = batch
    else:
        bb = _choose_block_batch(batch, inp, max_dim, itemsize)

    # Pad awkward batch sizes instead of asserting / degenerating to tiny blocks.
    padded_batch = batch if bb == batch else _round_up(batch, bb)
    if x.dtype != matmul_dtype:
        x = x.astype(matmul_dtype)                  # single wrapper-side cast (bf16 path)
    if padded_batch != batch:
        x = jnp.pad(x, ((0, padded_batch - batch), (0, 0)))
    grid = (padded_batch // bb,)

    # Parameters are small and resident: full-array blocks, constant index_map (no re-DMA).
    # Single-buffer them (no "next block" ever needed) to halve their VMEM footprint.
    if single_buffer_params:
        param_specs = [pl.BlockSpec(q.shape, lambda i: (0, 0),
                                    pipeline_mode=pl.Buffered(1)) for q in p]
    else:
        param_specs = [pl.BlockSpec(q.shape, lambda i: (0, 0)) for q in p]

    in_specs = [pl.BlockSpec((bb, inp), lambda i: (i, 0))] + param_specs
    out_spec = pl.BlockSpec((bb, padded_out), lambda i: (i, 0))   # lane-dense (128-padded) stores

    param_bytes = sum(int(q.size) * q.dtype.itemsize for q in p)
    io_bytes = bb * inp * itemsize + bb * padded_out * 4
    budget = _vmem_budget_bytes()
    vmem_limit = int(min(budget, max(16 * 1024 * 1024, 4 * (param_bytes + io_bytes))))
    # TODO(synk): if param_bytes alone exceeds `budget` (huge MLPs, esp. on v7x's 64 MiB),
    # switch to streaming weights per layer (pltpu.emit_pipeline over layers / tile the
    # hidden N dim in 128-lane chunks) instead of keeping all layers resident.

    kernel = functools.partial(_mlp_kernel, final_act, num_layers, matmul_dtype)

    y = pl.pallas_call(
        kernel,
        out_shape=jax.ShapeDtypeStruct((padded_batch, padded_out), jnp.float32),
        grid_spec=pltpu.PrefetchScalarGridSpec(
            num_scalar_prefetch=0,
            grid=grid,
            in_specs=in_specs,
            out_specs=out_spec,
        ),
        compiler_params=pltpu.CompilerParams(
            dimension_semantics=("parallel",),
            vmem_limit_bytes=vmem_limit,
        ),
    )(x, *p)
    return y[:batch, :out_dim]


def build_torch_nn_forward(weights, biases, final_act='affine',
                           matmul_dtype=jnp.float32, block_batch=None):
    """Returns a callable x -> y equivalent to torch_NN.forward(x).

    weights[i]: PyTorch layout (out_i, in_i); biases[i]: (out_i,)
    matmul_dtype: jnp.float32 (default, bit-tight vs reference) or jnp.bfloat16 for
    higher MXU throughput on v6e/v7x (opt-in: won't meet 1e-5 parity).
    """
    params, out_dim, padded_out = _prepare_params(weights, biases, matmul_dtype)
    num_layers = len(weights)

    def make_fwd(single_buffer_params):
        return jax.jit(functools.partial(
            _forward_impl, single_buffer_params, final_act, num_layers,
            matmul_dtype, out_dim, padded_out, block_batch))

    state = {"fwd": make_fwd(True), "fell_back": False}

    def call(x):
        try:
            return state["fwd"](x, *params)
        except Exception:
            # pl.Buffered(1) on resident-weight BlockSpecs isn't accepted by every
            # jax/libtpu version; fall back once to default double-buffered specs.
            if state["fell_back"]:
                raise
            state["fell_back"] = True
            state["fwd"] = make_fwd(False)
            return state["fwd"](x, *params)

    return call


def _reference_forward(x, weights, biases, final_act='affine'):
    h = x
    n = len(weights)
    for i, (w, b) in enumerate(zip(weights, biases)):
        h = h @ w.T + b
        if i < n - 1:
            h = jnp.maximum(h, 0.0)
    if final_act == 'relu':
        h = jnp.maximum(h, 0.0)
    elif final_act == 'sigmoid':
        h = jax.nn.sigmoid(h)
    elif final_act == 'tanh':
        h = jnp.tanh(h)
    elif final_act == 'exp':
        h = jnp.exp(h)
    return h


if __name__ == "__main__":
    # torch_NN(inp=16, out=8, hidden=[32, 32], final_act='affine', bias=True)
    inp, out, hidden = 16, 8, [32, 32]
    batch = 64

    dims = [inp] + hidden + [out]
    key = jax.random.PRNGKey(0)
    weights, biases = [], []
    for i in range(len(dims) - 1):
        fan_in, fan_out = dims[i], dims[i + 1]
        key, kw, kb = jax.random.split(key, 3)
        bound = 1.0 / (fan_in ** 0.5)
        # deterministic init mimicking nn.Linear's uniform init (PyTorch layout: (out, in))
        weights.append(jax.random.uniform(kw, (fan_out, fan_in), jnp.float32, -bound, bound))
        biases.append(jax.random.uniform(kb, (fan_out,), jnp.float32, -bound, bound))

    key, kx = jax.random.split(key)
    x = jax.random.normal(kx, (batch, inp), jnp.float32)

    # 1) Default f32 path: exact check vs JAX reference (lane-padded output is sliced back).
    forward = build_torch_nn_forward(weights, biases, final_act='affine')
    y = jax.block_until_ready(forward(x))
    y_ref = _reference_forward(x, weights, biases, 'affine')
    assert y.shape == (batch, out)
    assert jnp.allclose(y, y_ref, atol=1e-5, rtol=1e-5), "mismatch vs JAX reference"

    # 2) tanh final act + awkward batch / user block_batch: exercises the padded-batch,
    #    multi-step-grid path (batch=52, bb=24 -> padded to 72, 3 grid steps).
    x2 = jax.random.normal(kx, (52, inp), jnp.float32)
    forward_tanh = build_torch_nn_forward(weights, biases, final_act='tanh', block_batch=24)
    y_t = jax.block_until_ready(forward_tanh(x2))
    y_t_ref = _reference_forward(x2, weights, biases, 'tanh')
    assert y_t.shape == (52, out)
    assert jnp.allclose(y_t, y_t_ref, atol=1e-5, rtol=1e-5), "mismatch (tanh) vs JAX reference"

    # 3) Opt-in bf16 MXU path (f32 accumulation): looser tolerance.
    forward_bf16 = build_torch_nn_forward(weights, biases, final_act='affine',
                                          matmul_dtype=jnp.bfloat16)
    y_b = jax.block_until_ready(forward_bf16(x))
    assert jnp.allclose(y_b, y_ref, atol=5e-2, rtol=5e-2), "mismatch (bf16) vs JAX reference"

    print("KERNEL_OK")
</pallas_src>

<mosaic_0001>
module attributes {stable_mosaic.version = 11 : i64} {
  func.func @_mlp_kernel(%arg0: i32, %arg1: memref<64x16xf32, #tpu.memory_space<vmem>>, %arg2: memref<16x32xf32, #tpu.memory_space<vmem>>, %arg3: memref<1x32xf32, #tpu.memory_space<vmem>>, %arg4: memref<32x32xf32, #tpu.memory_space<vmem>>, %arg5: memref<1x32xf32, #tpu.memory_space<vmem>>, %arg6: memref<32x128xf32, #tpu.memory_space<vmem>>, %arg7: memref<1x128xf32, #tpu.memory_space<vmem>>, %arg8: memref<64x128xf32, #tpu.memory_space<vmem>>) attributes {dimension_semantics = [#tpu.dimension_semantics<parallel>], iteration_bounds = array<i64: 1>, scalar_prefetch = 0 : i64, scratch_operands = 0 : i64, tpu.core_type = #tpu.core_type<tc>, window_params = [{transform_indices = @transform_0, window_bounds = array<i64: 64, 16>}, {pipeline_mode = #tpu.pipeline_mode<synchronous>, transform_indices = @transform_1, window_bounds = array<i64: 16, 32>}, {pipeline_mode = #tpu.pipeline_mode<synchronous>, transform_indices = @transform_2, window_bounds = array<i64: 1, 32>}, {pipeline_mode = #tpu.pipeline_mode<synchronous>, transform_indices = @transform_3, window_bounds = array<i64: 32, 32>}, {pipeline_mode = #tpu.pipeline_mode<synchronous>, transform_indices = @transform_4, window_bounds = array<i64: 1, 32>}, {pipeline_mode = #tpu.pipeline_mode<synchronous>, transform_indices = @transform_5, window_bounds = array<i64: 32, 128>}, {pipeline_mode = #tpu.pipeline_mode<synchronous>, transform_indices = @transform_6, window_bounds = array<i64: 1, 128>}, {transform_indices = @transform_7, window_bounds = array<i64: 64, 128>}]} {
    %c0 = arith.constant 0 : index
    %c0_0 = arith.constant 0 : index
    %0 = vector.load %arg1[%c0, %c0_0] : memref<64x16xf32, #tpu.memory_space<vmem>>, vector<64x16xf32>
    %c0_1 = arith.constant 0 : index
    %c0_2 = arith.constant 0 : index
    %1 = vector.load %arg2[%c0_1, %c0_2] : memref<16x32xf32, #tpu.memory_space<vmem>>, vector<16x32xf32>
    %c0_3 = arith.constant 0 : index
    %c0_4 = arith.constant 0 : index
    %2 = vector.load %arg3[%c0_3, %c0_4] : memref<1x32xf32, #tpu.memory_space<vmem>>, vector<1x32xf32>
    %cst = arith.constant dense<0.000000e+00> : vector<64x32xf32>
    %3 = tpu.matmul %0, %1, %cst {dimension_numbers = #tpu.dot_dimension_numbers<[1], [0], [0], [1], [0, 0, 1, 1], [], []>} : vector<64x16xf32>, vector<16x32xf32>, vector<64x32xf32> -> vector<64x32xf32>
    %4 = vector.broadcast %2 : vector<1x32xf32> to vector<64x32xf32>
    %5 = arith.addf %3, %4 : vector<64x32xf32>
    %cst_5 = arith.constant 0.000000e+00 : f32
    %6 = vector.broadcast %cst_5 : f32 to vector<64x32xf32>
    %7 = arith.maximumf %5, %6 : vector<64x32xf32>
    %c0_6 = arith.constant 0 : index
    %c0_7 = arith.constant 0 : index
    %8 = vector.load %arg4[%c0_6, %c0_7] : memref<32x32xf32, #tpu.memory_space<vmem>>, vector<32x32xf32>
    %c0_8 = arith.constant 0 : index
    %c0_9 = arith.constant 0 : index
    %9 = vector.load %arg5[%c0_8, %c0_9] : memref<1x32xf32, #tpu.memory_space<vmem>>, vector<1x32xf32>
    %cst_10 = arith.constant dense<0.000000e+00> : vector<64x32xf32>
    %10 = tpu.matmul %7, %8, %cst_10 {dimension_numbers = #tpu.dot_dimension_numbers<[1], [0], [0], [1], [0, 0, 1, 1], [], []>} : vector<64x32xf32>, vector<32x32xf32>, vector<64x32xf32> -> vector<64x32xf32>
    %11 = vector.broadcast %9 : vector<1x32xf32> to vector<64x32xf32>
    %12 = arith.addf %10, %11 : vector<64x32xf32>
    %cst_11 = arith.constant 0.000000e+00 : f32
    %13 = vector.broadcast %cst_11 : f32 to vector<64x32xf32>
    %14 = arith.maximumf %12, %13 : vector<64x32xf32>
    %c0_12 = arith.constant 0 : index
    %c0_13 = arith.constant 0 : index
    %15 = vector.load %arg6[%c0_12, %c0_13] : memref<32x128xf32, #tpu.memory_space<vmem>>, vector<32x128xf32>
    %c0_14 = arith.constant 0 : index
    %c0_15 = arith.constant 0 : index
    %16 = vector.load %arg7[%c0_14, %c0_15] : memref<1x128xf32, #tpu.memory_space<vmem>>, vector<1x128xf32>
    %cst_16 = arith.constant dense<0.000000e+00> : vector<64x128xf32>
    %17 = tpu.matmul %14, %15, %cst_16 {dimension_numbers = #tpu.dot_dimension_numbers<[1], [0], [0], [1], [0, 0, 1, 1], [], []>} : vector<64x32xf32>, vector<32x128xf32>, vector<64x128xf32> -> vector<64x128xf32>
    %18 = vector.broadcast %16 : vector<1x128xf32> to vector<64x128xf32>
    %19 = arith.addf %17, %18 : vector<64x128xf32>
    %c0_17 = arith.constant 0 : index
    %c0_18 = arith.constant 0 : index
    %20 = vector.load %arg8[%c0_17, %c0_18] : memref<64x128xf32, #tpu.memory_space<vmem>>, vector<64x128xf32>
    tpu.vector_store %arg8[%c0_17, %c0_18], %19 {strides = array<i32>} : memref<64x128xf32, #tpu.memory_space<vmem>>, vector<64x128xf32>,
    return
  }
  func.func @transform_0(%arg0: i32) -> (i32, i32) {
    %c0_i32 = arith.constant 0 : i32
    %c0_i32_0 = arith.constant 0 : i32
    return %arg0, %c0_i32 : i32, i32
  }
  func.func @transform_1(%arg0: i32) -> (i32, i32) {
    %c0_i32 = arith.constant 0 : i32
    %c0_i32_0 = arith.constant 0 : i32
    %c0_i32_1 = arith.constant 0 : i32
    return %c0_i32, %c0_i32_0 : i32, i32
  }
  func.func @transform_2(%arg0: i32) -> (i32, i32) {
    %c0_i32 = arith.constant 0 : i32
    %c0_i32_0 = arith.constant 0 : i32
    %c0_i32_1 = arith.constant 0 : i32
    return %c0_i32, %c0_i32_0 : i32, i32
  }
  func.func @transform_3(%arg0: i32) -> (i32, i32) {
    %c0_i32 = arith.constant 0 : i32
    %c0_i32_0 = arith.constant 0 : i32
    %c0_i32_1 = arith.constant 0 : i32
    return %c0_i32, %c0_i32_0 : i32, i32
  }
  func.func @transform_4(%arg0: i32) -> (i32, i32) {
    %c0_i32 = arith.constant 0 : i32
    %c0_i32_0 = arith.constant 0 : i32
    %c0_i32_1 = arith.constant 0 : i32
    return %c0_i32, %c0_i32_0 : i32, i32
  }
  func.func @transform_5(%arg0: i32) -> (i32, i32) {
    %c0_i32 = arith.constant 0 : i32
    %c0_i32_0 = arith.constant 0 : i32
    %c0_i32_1 = arith.constant 0 : i32
    return %c0_i32, %c0_i32_0 : i32, i32
  }
  func.func @transform_6(%arg0: i32) -> (i32, i32) {
    %c0_i32 = arith.constant 0 : i32
    %c0_i32_0 = arith.constant 0 : i32
    %c0_i32_1 = arith.constant 0 : i32
    return %c0_i32, %c0_i32_0 : i32, i32
  }
  func.func @transform_7(%arg0: i32) -> (i32, i32) {
    %c0_i32 = arith.constant 0 : i32
    %c0_i32_0 = arith.constant 0 : i32
    return %arg0, %c0_i32 : i32, i32
  }
}

module attributes {stable_mosaic.version = 11 : i64} {
  func.func @_mlp_kernel(%arg0: i32, %arg1: memref<64x16xf32, #tpu.memory_space<vmem>>, %arg2: memref<16x32xf32, #tpu.memory_space<vmem>>, %arg3: memref<1x32xf32, #tpu.memory_space<vmem>>, %arg4: memref<32x32xf32, #tpu.memory_space<vmem>>, %arg5: memref<1x32xf32, #tpu.memory_space<vmem>>, %arg6: memref<32x128xf32, #tpu.memory_space<vmem>>, %arg7: memref<1x128xf32, #tpu.memory_space<vmem>>, %arg8: memref<64x128xf32, #tpu.memory_space<vmem>>) attributes {dimension_semantics = [#tpu.dimension_semantics<parallel>], iteration_bounds = array<i64: 1>, scalar_prefetch = 0 : i64, scratch_operands = 0 : i64, tpu.core_type = #tpu.core_type<tc>, window_params = [{transform_indices = @transform_0, window_bounds = array<i64: 64, 16>}, {pipeline_mode = #tpu.pipeline_mode<synchronous>, transform_indices = @transform_1, window_bounds = array<i64: 16, 32>}, {pipeline_mode = #tpu.pipeline_mode<synchronous>, transform_indices = @transform_2, window_bounds = array<i64: 1, 32>}, {pipeline_mode = #tpu.pipeline_mode<synchronous>, transform_indices = @transform_3, window_bounds = array<i64: 32, 32>}, {pipeline_mode = #tpu.pipeline_mode<synchronous>, transform_indices = @transform_4, window_bounds = array<i64: 1, 32>}, {pipeline_mode = #tpu.pipeline_mode<synchronous>, transform_indices = @transform_5, window_bounds = array<i64: 32, 128>}, {pipeline_mode = #tpu.pipeline_mode<synchronous>, transform_indices = @transform_6, window_bounds = array<i64: 1, 128>}, {transform_indices = @transform_7, window_bounds = array<i64: 64, 128>}]} {
    %c0 = arith.constant 0 : index
    %c0_0 = arith.constant 0 : index
    %0 = vector.load %arg1[%c0, %c0_0] : memref<64x16xf32, #tpu.memory_space<vmem>>, vector<64x16xf32>
    %c0_1 = arith.constant 0 : index
    %c0_2 = arith.constant 0 : index
    %1 = vector.load %arg2[%c0_1, %c0_2] : memref<16x32xf32, #tpu.memory_space<vmem>>, vector<16x32xf32>
    %c0_3 = arith.constant 0 : index
    %c0_4 = arith.constant 0 : index
    %2 = vector.load %arg3[%c0_3, %c0_4] : memref<1x32xf32, #tpu.memory_space<vmem>>, vector<1x32xf32>
    %cst = arith.constant dense<0.000000e+00> : vector<64x32xf32>
    %3 = tpu.matmul %0, %1, %cst {dimension_numbers = #tpu.dot_dimension_numbers<[1], [0], [0], [1], [0, 0, 1, 1], [], []>} : vector<64x16xf32>, vector<16x32xf32>, vector<64x32xf32> -> vector<64x32xf32>
    %4 = vector.broadcast %2 : vector<1x32xf32> to vector<64x32xf32>
    %5 = arith.addf %3, %4 : vector<64x32xf32>
    %cst_5 = arith.constant 0.000000e+00 : f32
    %6 = vector.broadcast %cst_5 : f32 to vector<64x32xf32>
    %7 = arith.maximumf %5, %6 : vector<64x32xf32>
    %c0_6 = arith.constant 0 : index
    %c0_7 = arith.constant 0 : index
    %8 = vector.load %arg4[%c0_6, %c0_7] : memref<32x32xf32, #tpu.memory_space<vmem>>, vector<32x32xf32>
    %c0_8 = arith.constant 0 : index
    %c0_9 = arith.constant 0 : index
    %9 = vector.load %arg5[%c0_8, %c0_9] : memref<1x32xf32, #tpu.memory_space<vmem>>, vector<1x32xf32>
    %cst_10 = arith.constant dense<0.000000e+00> : vector<64x32xf32>
    %10 = tpu.matmul %7, %8, %cst_10 {dimension_numbers = #tpu.dot_dimension_numbers<[1], [0], [0], [1], [0, 0, 1, 1], [], []>} : vector<64x32xf32>, vector<32x32xf32>, vector<64x32xf32> -> vector<64x32xf32>
    %11 = vector.broadcast %9 : vector<1x32xf32> to vector<64x32xf32>
    %12 = arith.addf %10, %11 : vector<64x32xf32>
    %cst_11 = arith.constant 0.000000e+00 : f32
    %13 = vector.broadcast %cst_11 : f32 to vector<64x32xf32>
    %14 = arith.maximumf %12, %13 : vector<64x32xf32>
    %c0_12 = arith.constant 0 : index
    %c0_13 = arith.constant 0 : index
    %15 = vector.load %arg6[%c0_12, %c0_13] : memref<32x128xf32, #tpu.memory_space<vmem>>, vector<32x128xf32>
    %c0_14 = arith.constant 0 : index
    %c0_15 = arith.constant 0 : index
    %16 = vector.load %arg7[%c0_14, %c0_15] : memref<1x128xf32, #tpu.memory_space<vmem>>, vector<1x128xf32>
    %cst_16 = arith.constant dense<0.000000e+00> : vector<64x128xf32>
    %17 = tpu.matmul %14, %15, %cst_16 {dimension_numbers = #tpu.dot_dimension_numbers<[1], [0], [0], [1], [0, 0, 1, 1], [], []>} : vector<64x32xf32>, vector<32x128xf32>, vector<64x128xf32> -> vector<64x128xf32>
    %18 = vector.broadcast %16 : vector<1x128xf32> to vector<64x128xf32>
    %19 = arith.addf %17, %18 : vector<64x128xf32>
    %c0_17 = arith.constant 0 : index
    %c0_18 = arith.constant 0 : index
    %20 = vector.load %arg8[%c0_17, %c0_18] : memref<64x128xf32, #tpu.memory_space<vmem>>, vector<64x128xf32>
    tpu.vector_store %arg8[%c0_17, %c0_18], %19 {strides = array<i32>} : memref<64x128xf32, #tpu.memory_space<vmem>>, vector<64x128xf32>,
    return
  }
  func.func @transform_0(%arg0: i32) -> (i32, i32) {
    %c0_i32 = arith.constant 0 : i32
    %c0_i32_0 = arith.constant 0 : i32
    return %arg0, %c0_i32 : i32, i32
  }
  func.func @transform_1(%arg0: i32) -> (i32, i32) {
    %c0_i32 = arith.constant 0 : i32
    %c0_i32_0 = arith.constant 0 : i32
    %c0_i32_1 = arith.constant 0 : i32
    return %c0_i32, %c0_i32_0 : i32, i32
  }
  func.func @transform_2(%arg0: i32) -> (i32, i32) {
    %c0_i32 = arith.constant 0 : i32
    %c0_i32_0 = arith.constant 0 : i32
    %c0_i32_1 = arith.constant 0 : i32
    return %c0_i32, %c0_i32_0 : i32, i32
  }
  func.func @transform_3(%arg0: i32) -> (i32, i32) {
    %c0_i32 = arith.constant 0 : i32
    %c0_i32_0 = arith.constant 0 : i32
    %c0_i32_1 = arith.constant 0 : i32
    return %c0_i32, %c0_i32_0 : i32, i32
  }
  func.func @transform_4(%arg0: i32) -> (i32, i32) {
    %c0_i32 = arith.constant 0 : i32
    %c0_i32_0 = arith.constant 0 : i32
    %c0_i32_1 = arith.constant 0 : i32
    return %c0_i32, %c0_i32_0 : i32, i32
  }
  func.func @transform_5(%arg0: i32) -> (i32, i32) {
    %c0_i32 = arith.constant 0 : i32
    %c0_i32_0 = arith.constant 0 : i32
    %c0_i32_1 = arith.constant 0 : i32
    return %c0_i32, %c0_i32_0 : i32, i32
  }
  func.func @transform_6(%arg0: i32) -> (i32, i32) {
    %c0_i32 = arith.constant 0 : i32
    %c0_i32_0 = arith.constant 0 : i32
    %c0_i32_1 = arith.constant 0 : i32
    return %c0_i32, %c0_i32_0 : i32, i32
  }
  func.func @transform_7(%arg0: i32) -> (i32, i32) {
    %c0_i32 = arith.constant 0 : i32
    %c0_i32_0 = arith.constant 0 : i32
    return %arg0, %c0_i32 : i32, i32
  }
}

</mosaic_0001>

<bundles_post_ra>
// kernel: _forward_impl.1
= control target key start
LH: loop header
LB: loop body
LE: loop exit
PB: predicated region body
PF: predicated region fallthrough
CT: control target
= control target key end

     0   :  { %vm43_vm0 = vcmask 130048   ;;  %vm192_vm1 = vcmask 261120   ;;  %s754_s1 = inlined_call_operand.vmem [shape: f32[16,32], index: 1, kind: input, shape index: {}]   ;;  %s755_s0 = inlined_call_operand.vmem [shape: f32[64,16], index: 0, kind: input, shape index: {}]   ;;  %s756_s3 = inlined_call_operand.vmem [shape: f32[32,32], index: 3, kind: input, shape index: {}]   ;;  %s757_s5 = inlined_call_operand.vmem [shape: f32[32,128], index: 5, kind: input, shape index: {}]   ;;  %s758_s2 = inlined_call_operand.vmem [shape: f32[1,32], index: 2, kind: input, shape index: {}]   ;;  %s759_s4 = inlined_call_operand.vmem [shape: f32[1,32], index: 4, kind: input, shape index: {}]   ;;  %s760_s6 = inlined_call_operand.vmem [shape: f32[1,128], index: 6, kind: input, shape index: {}]   ;;  %s761_s7 = inlined_call_operand.vmem [shape: f32[64,128], index: 7, kind: output, shape index: {}]  }
   0x1   :  { %v35_v0 = vld [vmem:[%s754_s1 + $0x8] sm:$0xff]  ;;  %v34_v1 = vld [vmem:[%s754_s1] sm:$0xff]  ;;  %v28_v4 = vld [vmem:[%s755_s0 + $0x10] sm:$0xff] }
   0x2   :  { %v26_v2 = vld [vmem:[%s755_s0] sm:$0xff]  ;;  %543 = vmatprep.subr.mxu0 %v35_v0  ;;  %v27_v3 = vld [vmem:[%s755_s0 + $0x8] sm:$0xff]  ;;  %599 = vmatprep.subr.mxu1 %v35_v0  ;;  %v184_v7 = vld [vmem:[%s756_s3 + $0x18] sm:$0xff] }
   0x3   :  { %547 = vmatprep.mubr.msk.f32.mxu0 %vm43_vm0, %v26_v2  ;;  %544 = vmatpush3.msra.mxu0 %v35_v0  ;;  %v30_v5 = vld [vmem:[%s755_s0 + $0x20] sm:$0xff]  ;;  %v31_v6 = vld [vmem:[%s755_s0 + $0x28] sm:$0xff]  ;;  %v32_v8 = vld [vmem:[%s755_s0 + $0x30] sm:$0xff] }
   0x4   :  { %545 = vmatprep.subr.mxu0 %v34_v1  ;;  %601 = vmatpush3.msra.mxu1 %v35_v0  ;;  %v29_v9 = vld [vmem:[%s755_s0 + $0x18] sm:$0xff]  ;;  %v183_v11 = vld [vmem:[%s756_s3 + $0x10] sm:$0xff]  ;;  %v182_v12 = vld [vmem:[%s756_s3 + $0x8] sm:$0xff] }
   0x5   :  { %546 = vmatpush3.msra.mxu0 %v34_v1  ;;  %600 = vmatprep.subr.mxu1 %v34_v1  ;;  %v33_v10 = vld [vmem:[%s755_s0 + $0x38] sm:$0xff]  ;;  %v181_v13 = vld [vmem:[%s756_s3] sm:$0xff]  ;;  %v332_v40 = vld [vmem:[%s757_s5 + $0x10] sm:$0xff] }
   0x6   :  { %548 = vmatmul.mubr.msk.f32.vlgmr.msra.gmra.mxu0 %vm43_vm0, %v27_v3  ;;  %602 = vmatpush3.msra.mxu1 %v34_v1  ;;  %v333_v14 = vld [vmem:[%s757_s5 + $0x18] sm:$0xff]  ;;  %v482_v15 = vld [vmem:[%s758_s2] ss:$0 sm:$0xff]  ;;  %v331_v41 = vld [vmem:[%s757_s5 + $0x8] sm:$0xff] }
   0x7   :  { %550 = vmatprep.mubr.msk.f32.mxu0 %vm43_vm0, %v28_v4  ;;  %553 = vmatprep.mubr.msk.f32.mxu1 %vm43_vm0, %v30_v5  ;;  %v330_v42 = vld [vmem:[%s757_s5] sm:$0xff] }
   0x8   :  { %554 = vmatmul.mubr.msk.f32.vlgmr.msra.gmra.mxu1 %vm43_vm0, %v31_v6  ;;  %559 = vmatprep.subr.mxu1 %v184_v7  ;;  %v491_v43 = vld [vmem:[%s759_s4] ss:$0 sm:$0xff] }
   0x9   :  { %556 = vmatprep.mubr.msk.f32.mxu1 %vm43_vm0, %v32_v8  ;;  %560 = vmatpush3.msra.mxu1 %v184_v7  ;;  %v500_v4 = vld [vmem:[%s760_s6] ss:$0 sm:$0xff] }
   0xa   :  { %551 = vmatmul.mubr.msk.f32.gmra.mxu0 %vm43_vm0, %v29_v9  ;;  %561 = vmatprep.subr.mxu1 %v183_v11 }
   0xb   :  { %562 = vmatpush3.msra.mxu1 %v183_v11  ;;  %579 = vmatprep.subr.mxu0 %v333_v14 }
   0xc   :  { %557 = vmatmul.mubr.msk.f32.gmra.mxu1 %vm43_vm0, %v33_v10  ;;  %563 = vmatprep.subr.mxu1 %v182_v12 }
   0xd   :  { %564 = vmatpush3.msra.mxu1 %v182_v12  ;;  %580 = vmatpush3.msra.mxu0 %v333_v14 }
   0xe   :  { %565 = vmatprep.subr.mxu1 %v181_v13  ;;  %581 = vmatprep.subr.mxu0 %v332_v40 }
   0xf   :  { %566 = vmatpush3.msra.mxu1 %v181_v13  ;;  %582 = vmatpush3.msra.mxu0 %v332_v40 }
  0x10   :  { %583 = vmatprep.subr.mxu0 %v331_v41 }
  0x11   :  { %584 = vmatpush3.msra.mxu0 %v331_v41 }
  0x12   :  { %585 = vmatprep.subr.mxu0 %v330_v42 }
  0x13   :  { %586 = vmatpush3.msra.mxu0 %v330_v42 }
  0xc6   :  { %v549_v16 = vpop.f32.mrf.mxu0 }
  0xc7   :  { %v140_v17 = vadd.f32 %v549_v16, %v482_v15 }
  0xc8   :  { %v134_v18 = vpop.f32.mrf.mxu0  ;;  %v555_v19 = vpop.f32.mrf.mxu1 }
  0xc9   :  { %v135_v20 = vadd.f32 %v482_v15, %v134_v18  ;;  %v174_v25 = vmax.f32 %v140_v17, 0.0  ;;  %v160_v35 = vadd.f32 %v555_v19, %v482_v15 }
  0xca   :  { %v552_v21 = vpop.f32.mrf.mxu0  ;;  %v154_v22 = vpop.f32.mrf.mxu1 }
  0xcb   :  { %v173_v23 = vmax.f32 %v135_v20, 0.0  ;;  %v155_v24 = vadd.f32 %v482_v15, %v154_v22  ;;  %v150_v26 = vadd.f32 %v552_v21, %v482_v15  ;;  %v178_v37 = vmax.f32 %v160_v35, 0.0 }
  0xcc   :  { %v144_v27 = vpop.f32.mrf.mxu0  ;;  %v558_v28 = vpop.f32.mrf.mxu1 }
  0xcd   :  { %v145_v29 = vadd.f32 %v482_v15, %v144_v27  ;;  %567 = vmatprep.mubr.msk.f32.mxu1 %vm192_vm1, %v173_v23  ;;  %v177_v32 = vmax.f32 %v155_v24, 0.0  ;;  %v176_v34 = vmax.f32 %v150_v26, 0.0  ;;  %v170_v38 = vadd.f32 %v558_v28, %v482_v15 }
  0xce   :  { %568 = vmatmul.mubr.msk.f32.vlgmr.msra.gmra.mxu1 %vm192_vm1, %v174_v25  ;;  %v164_v30 = vpop.f32.mrf.mxu1 }
  0xcf   :  { %v175_v31 = vmax.f32 %v145_v29, 0.0  ;;  %v165_v33 = vadd.f32 %v482_v15, %v164_v30  ;;  %v180_v39 = vmax.f32 %v170_v38, 0.0 }
  0xd1   :  { %570 = vmatprep.mubr.msk.f32.mxu1 %vm192_vm1, %v175_v31  ;;  %v179_v36 = vmax.f32 %v165_v33, 0.0 }
  0xd2   :  { %571 = vmatmul.mubr.msk.f32.gmra.mxu1 %vm192_vm1, %v176_v34 }
  0xd3   :  { %573 = vmatprep.mubr.msk.f32.mxu1 %vm192_vm1, %v177_v32 }
  0xd6   :  { %574 = vmatmul.mubr.msk.f32.gmra.mxu1 %vm192_vm1, %v178_v37 }
  0xd7   :  { %576 = vmatprep.mubr.msk.f32.mxu1 %vm192_vm1, %v179_v36 }
  0xda   :  { %577 = vmatmul.mubr.msk.f32.gmra.mxu1 %vm192_vm1, %v180_v39 }
 0x18e   :  { %v569_v44 = vpop.f32.mrf.mxu1 }
 0x18f   :  { %v289_v45 = vadd.f32 %v569_v44, %v491_v43 }
 0x190   :  { %v283_v46 = vpop.f32.mrf.mxu1 }
 0x191   :  { %v284_v47 = vadd.f32 %v491_v43, %v283_v46  ;;  %v323_v50 = vmax.f32 %v289_v45, 0.0 }
 0x192   :  { %v572_v48 = vpop.f32.mrf.mxu1 }
 0x193   :  { %v322_v49 = vmax.f32 %v284_v47, 0.0  ;;  %v299_v51 = vadd.f32 %v572_v48, %v491_v43 }
 0x194   :  { %v293_v52 = vpop.f32.mrf.mxu1 }
 0x195   :  { %v294_v53 = vadd.f32 %v491_v43, %v293_v52  ;;  %587 = vmatprep.mubr.msk.f32.mxu0 %vm192_vm1, %v322_v49  ;;  %v325_v56 = vmax.f32 %v299_v51, 0.0 }
 0x196   :  { %v575_v54 = vpop.f32.mrf.mxu1  ;;  %588 = vmatmul.mubr.msk.f32.vlgmr.msra.gmra.mxu0 %vm192_vm1, %v323_v50 }
 0x197   :  { %v324_v55 = vmax.f32 %v294_v53, 0.0  ;;  %v309_v57 = vadd.f32 %v575_v54, %v491_v43 }
 0x198   :  { %v303_v58 = vpop.f32.mrf.mxu1 }
 0x199   :  { %v304_v59 = vadd.f32 %v491_v43, %v303_v58  ;;  %590 = vmatprep.mubr.msk.f32.mxu0 %vm192_vm1, %v324_v55  ;;  %v327_v62 = vmax.f32 %v309_v57, 0.0 }
 0x19a   :  { %v578_v60 = vpop.f32.mrf.mxu1  ;;  %591 = vmatmul.mubr.msk.f32.gmra.mxu0 %vm192_vm1, %v325_v56 }
 0x19b   :  { %v326_v61 = vmax.f32 %v304_v59, 0.0  ;;  %v319_v63 = vadd.f32 %v578_v60, %v491_v43 }
 0x19c   :  { %v313_v0 = vpop.f32.mrf.mxu1 }
 0x19d   :  { %v314_v1 = vadd.f32 %v491_v43, %v313_v0  ;;  %593 = vmatprep.mubr.msk.f32.mxu0 %vm192_vm1, %v326_v61  ;;  %v329_v3 = vmax.f32 %v319_v63, 0.0 }
 0x19e   :  { %594 = vmatmul.mubr.msk.f32.gmra.mxu0 %vm192_vm1, %v327_v62 }
 0x19f   :  { %v328_v2 = vmax.f32 %v314_v1, 0.0 }
 0x1a1   :  { %596 = vmatprep.mubr.msk.f32.mxu0 %vm192_vm1, %v328_v2 }
 0x1a2   :  { %597 = vmatmul.mubr.msk.f32.gmra.mxu0 %vm192_vm1, %v329_v3 }
 0x256   :  { %v589_v5 = vpop.f32.mrf.mxu0 }
 0x257   :  { %v437_v6 = vadd.f32 %v589_v5, %v500_v4 }
 0x258   :  { %v431_v7 = vpop.f32.mrf.mxu0 }
 0x259   :  { %471 = vst [vmem:[%s761_s7 + $0x8] sm:$0xff] %v437_v6  ;;  %v432_v8 = vadd.f32 %v500_v4, %v431_v7 }
 0x25a   :  { %v592_v9 = vpop.f32.mrf.mxu0 }
 0x25b   :  { %470 = vst [vmem:[%s761_s7] sm:$0xff] %v432_v8  ;;  %v447_v10 = vadd.f32 %v592_v9, %v500_v4 }
 0x25c   :  { %v441_v11 = vpop.f32.mrf.mxu0 }
 0x25d   :  { %473 = vst [vmem:[%s761_s7 + $0x18] sm:$0xff] %v447_v10  ;;  %v442_v12 = vadd.f32 %v500_v4, %v441_v11 }
 0x25e   :  { %v595_v13 = vpop.f32.mrf.mxu0 }
 0x25f   :  { %472 = vst [vmem:[%s761_s7 + $0x10] sm:$0xff] %v442_v12  ;;  %v457_v14 = vadd.f32 %v595_v13, %v500_v4 }
 0x260   :  { %v451_v15 = vpop.f32.mrf.mxu0 }
 0x261   :  { %475 = vst [vmem:[%s761_s7 + $0x28] sm:$0xff] %v457_v14  ;;  %v452_v16 = vadd.f32 %v500_v4, %v451_v15 }
 0x262   :  { %v598_v17 = vpop.f32.mrf.mxu0 }
 0x263   :  { %474 = vst [vmem:[%s761_s7 + $0x20] sm:$0xff] %v452_v16  ;;  %v467_v18 = vadd.f32 %v598_v17, %v500_v4 }
 0x264   :  { %v461_v19 = vpop.f32.mrf.mxu0 }
 0x265   :  { %477 = vst [vmem:[%s761_s7 + $0x38] sm:$0xff] %v467_v18  ;;  %v462_v20 = vadd.f32 %v500_v4, %v461_v19 }
 0x267   :  { %476 = vst [vmem:[%s761_s7 + $0x30] sm:$0xff] %v462_v20 }

// kernel: _forward_impl.1
= control target key start
LH: loop header
LB: loop body
LE: loop exit
PB: predicated region body
PF: predicated region fallthrough
CT: control target
= control target key end

     0   :  { %vm43_vm0 = vcmask 130048   ;;  %vm192_vm1 = vcmask 261120   ;;  %s754_s1 = inlined_call_operand.vmem [shape: f32[16,32], index: 1, kind: input, shape index: {}]   ;;  %s755_s0 = inlined_call_operand.vmem [shape: f32[64,16], index: 0, kind: input, shape index: {}]   ;;  %s756_s3 = inlined_call_operand.vmem [shape: f32[32,32], index: 3, kind: input, shape index: {}]   ;;  %s757_s5 = inlined_call_operand.vmem [shape: f32[32,128], index: 5, kind: input, shape index: {}]   ;;  %s758_s2 = inlined_call_operand.vmem [shape: f32[1,32], index: 2, kind: input, shape index: {}]   ;;  %s759_s4 = inlined_call_operand.vmem [shape: f32[1,32], index: 4, kind: input, shape index: {}]   ;;  %s760_s6 = inlined_call_operand.vmem [shape: f32[1,128], index: 6, kind: input, shape index: {}]   ;;  %s761_s7 = inlined_call_operand.vmem [shape: f32[64,128], index: 7, kind: output, shape index: {}]  }
   0x1   :  { %v35_v0 = vld [vmem:[%s754_s1 + $0x8] sm:$0xff]  ;;  %v34_v1 = vld [vmem:[%s754_s1] sm:$0xff]  ;;  %v28_v4 = vld [vmem:[%s755_s0 + $0x10] sm:$0xff] }
   0x2   :  { %v26_v2 = vld [vmem:[%s755_s0] sm:$0xff]  ;;  %543 = vmatprep.subr.mxu0 %v35_v0  ;;  %v27_v3 = vld [vmem:[%s755_s0 + $0x8] sm:$0xff]  ;;  %599 = vmatprep.subr.mxu1 %v35_v0  ;;  %v184_v7 = vld [vmem:[%s756_s3 + $0x18] sm:$0xff] }
   0x3   :  { %547 = vmatprep.mubr.msk.f32.mxu0 %vm43_vm0, %v26_v2  ;;  %544 = vmatpush3.msra.mxu0 %v35_v0  ;;  %v30_v5 = vld [vmem:[%s755_s0 + $0x20] sm:$0xff]  ;;  %v31_v6 = vld [vmem:[%s755_s0 + $0x28] sm:$0xff]  ;;  %v32_v8 = vld [vmem:[%s755_s0 + $0x30] sm:$0xff] }
   0x4   :  { %545 = vmatprep.subr.mxu0 %v34_v1  ;;  %601 = vmatpush3.msra.mxu1 %v35_v0  ;;  %v29_v9 = vld [vmem:[%s755_s0 + $0x18] sm:$0xff]  ;;  %v183_v11 = vld [vmem:[%s756_s3 + $0x10] sm:$0xff]  ;;  %v182_v12 = vld [vmem:[%s756_s3 + $0x8] sm:$0xff] }
   0x5   :  { %546 = vmatpush3.msra.mxu0 %v34_v1  ;;  %600 = vmatprep.subr.mxu1 %v34_v1  ;;  %v33_v10 = vld [vmem:[%s755_s0 + $0x38] sm:$0xff]  ;;  %v181_v13 = vld [vmem:[%s756_s3] sm:$0xff]  ;;  %v332_v40 = vld [vmem:[%s757_s5 + $0x10] sm:$0xff] }
   0x6   :  { %548 = vmatmul.mubr.msk.f32.vlgmr.msra.gmra.mxu0 %vm43_vm0, %v27_v3  ;;  %602 = vmatpush3.msra.mxu1 %v34_v1  ;;  %v333_v14 = vld [vmem:[%s757_s5 + $0x18] sm:$0xff]  ;;  %v482_v15 = vld [vmem:[%s758_s2] ss:$0 sm:$0xff]  ;;  %v331_v41 = vld [vmem:[%s757_s5 + $0x8] sm:$0xff] }
   0x7   :  { %550 = vmatprep.mubr.msk.f32.mxu0 %vm43_vm0, %v28_v4  ;;  %553 = vmatprep.mubr.msk.f32.mxu1 %vm43_vm0, %v30_v5  ;;  %v330_v42 = vld [vmem:[%s757_s5] sm:$0xff] }
   0x8   :  { %554 = vmatmul.mubr.msk.f32.vlgmr.msra.gmra.mxu1 %vm43_vm0, %v31_v6  ;;  %559 = vmatprep.subr.mxu1 %v184_v7  ;;  %v491_v43 = vld [vmem:[%s759_s4] ss:$0 sm:$0xff] }
   0x9   :  { %556 = vmatprep.mubr.msk.f32.mxu1 %vm43_vm0, %v32_v8  ;;  %560 = vmatpush3.msra.mxu1 %v184_v7  ;;  %v500_v4 = vld [vmem:[%s760_s6] ss:$0 sm:$0xff] }
   0xa   :  { %551 = vmatmul.mubr.msk.f32.gmra.mxu0 %vm43_vm0, %v29_v9  ;;  %561 = vmatprep.subr.mxu1 %v183_v11 }
   0xb   :  { %562 = vmatpush3.msra.mxu1 %v183_v11  ;;  %579 = vmatprep.subr.mxu0 %v333_v14 }
   0xc   :  { %557 = vmatmul.mubr.msk.f32.gmra.mxu1 %vm43_vm0, %v33_v10  ;;  %563 = vmatprep.subr.mxu1 %v182_v12 }
   0xd   :  { %564 = vmatpush3.msra.mxu1 %v182_v12  ;;  %580 = vmatpush3.msra.mxu0 %v333_v14 }
   0xe   :  { %565 = vmatprep.subr.mxu1 %v181_v13  ;;  %581 = vmatprep.subr.mxu0 %v332_v40 }
   0xf   :  { %566 = vmatpush3.msra.mxu1 %v181_v13  ;;  %582 = vmatpush3.msra.mxu0 %v332_v40 }
  0x10   :  { %583 = vmatprep.subr.mxu0 %v331_v41 }
  0x11   :  { %584 = vmatpush3.msra.mxu0 %v331_v41 }
  0x12   :  { %585 = vmatprep.subr.mxu0 %v330_v42 }
  0x13   :  { %586 = vmatpush3.msra.mxu0 %v330_v42 }
  0xc6   :  { %v549_v16 = vpop.f32.mrf.mxu0 }
  0xc7   :  { %v140_v17 = vadd.f32 %v549_v16, %v482_v15 }
  0xc8   :  { %v134_v18 = vpop.f32.mrf.mxu0  ;;  %v555_v19 = vpop.f32.mrf.mxu1 }
  0xc9   :  { %v135_v20 = vadd.f32 %v482_v15, %v134_v18  ;;  %v174_v25 = vmax.f32 %v140_v17, 0.0  ;;  %v160_v35 = vadd.f32 %v555_v19, %v482_v15 }
  0xca   :  { %v552_v21 = vpop.f32.mrf.mxu0  ;;  %v154_v22 = vpop.f32.mrf.mxu1 }
  0xcb   :  { %v173_v23 = vmax.f32 %v135_v20, 0.0  ;;  %v155_v24 = vadd.f32 %v482_v15, %v154_v22  ;;  %v150_v26 = vadd.f32 %v552_v21, %v482_v15  ;;  %v178_v37 = vmax.f32 %v160_v35, 0.0 }
  0xcc   :  { %v144_v27 = vpop.f32.mrf.mxu0  ;;  %v558_v28 = vpop.f32.mrf.mxu1 }
  0xcd   :  { %v145_v29 = vadd.f32 %v482_v15, %v144_v27  ;;  %567 = vmatprep.mubr.msk.f32.mxu1 %vm192_vm1, %v173_v23  ;;  %v177_v32 = vmax.f32 %v155_v24, 0.0  ;;  %v176_v34 = vmax.f32 %v150_v26, 0.0  ;;  %v170_v38 = vadd.f32 %v558_v28, %v482_v15 }
  0xce   :  { %568 = vmatmul.mubr.msk.f32.vlgmr.msra.gmra.mxu1 %vm192_vm1, %v174_v25  ;;  %v164_v30 = vpop.f32.mrf.mxu1 }
  0xcf   :  { %v175_v31 = vmax.f32 %v145_v29, 0.0  ;;  %v165_v33 = vadd.f32 %v482_v15, %v164_v30  ;;  %v180_v39 = vmax.f32 %v170_v38, 0.0 }
  0xd1   :  { %570 = vmatprep.mubr.msk.f32.mxu1 %vm192_vm1, %v175_v31  ;;  %v179_v36 = vmax.f32 %v165_v33, 0.0 }
  0xd2   :  { %571 = vmatmul.mubr.msk.f32.gmra.mxu1 %vm192_vm1, %v176_v34 }
  0xd3   :  { %573 = vmatprep.mubr.msk.f32.mxu1 %vm192_vm1, %v177_v32 }
  0xd6   :  { %574 = vmatmul.mubr.msk.f32.gmra.mxu1 %vm192_vm1, %v178_v37 }
  0xd7   :  { %576 = vmatprep.mubr.msk.f32.mxu1 %vm192_vm1, %v179_v36 }
  0xda   :  { %577 = vmatmul.mubr.msk.f32.gmra.mxu1 %vm192_vm1, %v180_v39 }
 0x18e   :  { %v569_v44 = vpop.f32.mrf.mxu1 }
 0x18f   :  { %v289_v45 = vadd.f32 %v569_v44, %v491_v43 }
 0x190   :  { %v283_v46 = vpop.f32.mrf.mxu1 }
 0x191   :  { %v284_v47 = vadd.f32 %v491_v43, %v283_v46  ;;  %v323_v50 = vmax.f32 %v289_v45, 0.0 }
 0x192   :  { %v572_v48 = vpop.f32.mrf.mxu1 }
 0x193   :  { %v322_v49 = vmax.f32 %v284_v47, 0.0  ;;  %v299_v51 = vadd.f32 %v572_v48, %v491_v43 }
 0x194   :  { %v293_v52 = vpop.f32.mrf.mxu1 }
 0x195   :  { %v294_v53 = vadd.f32 %v491_v43, %v293_v52  ;;  %587 = vmatprep.mubr.msk.f32.mxu0 %vm192_vm1, %v322_v49  ;;  %v325_v56 = vmax.f32 %v299_v51, 0.0 }
 0x196   :  { %v575_v54 = vpop.f32.mrf.mxu1  ;;  %588 = vmatmul.mubr.msk.f32.vlgmr.msra.gmra.mxu0 %vm192_vm1, %v323_v50 }
 0x197   :  { %v324_v55 = vmax.f32 %v294_v53, 0.0  ;;  %v309_v57 = vadd.f32 %v575_v54, %v491_v43 }
 0x198   :  { %v303_v58 = vpop.f32.mrf.mxu1 }
 0x199   :  { %v304_v59 = vadd.f32 %v491_v43, %v303_v58  ;;  %590 = vmatprep.mubr.msk.f32.mxu0 %vm192_vm1, %v324_v55  ;;  %v327_v62 = vmax.f32 %v309_v57, 0.0 }
 0x19a   :  { %v578_v60 = vpop.f32.mrf.mxu1  ;;  %591 = vmatmul.mubr.msk.f32.gmra.mxu0 %vm192_vm1, %v325_v56 }
 0x19b   :  { %v326_v61 = vmax.f32 %v304_v59, 0.0  ;;  %v319_v63 = vadd.f32 %v578_v60, %v491_v43 }
 0x19c   :  { %v313_v0 = vpop.f32.mrf.mxu1 }
 0x19d   :  { %v314_v1 = vadd.f32 %v491_v43, %v313_v0  ;;  %593 = vmatprep.mubr.msk.f32.mxu0 %vm192_vm1, %v326_v61  ;;  %v329_v3 = vmax.f32 %v319_v63, 0.0 }
 0x19e   :  { %594 = vmatmul.mubr.msk.f32.gmra.mxu0 %vm192_vm1, %v327_v62 }
 0x19f   :  { %v328_v2 = vmax.f32 %v314_v1, 0.0 }
 0x1a1   :  { %596 = vmatprep.mubr.msk.f32.mxu0 %vm192_vm1, %v328_v2 }
 0x1a2   :  { %597 = vmatmul.mubr.msk.f32.gmra.mxu0 %vm192_vm1, %v329_v3 }
 0x256   :  { %v589_v5 = vpop.f32.mrf.mxu0 }
 0x257   :  { %v437_v6 = vadd.f32 %v589_v5, %v500_v4 }
 0x258   :  { %v431_v7 = vpop.f32.mrf.mxu0 }
 0x259   :  { %471 = vst [vmem:[%s761_s7 + $0x8] sm:$0xff] %v437_v6  ;;  %v432_v8 = vadd.f32 %v500_v4, %v431_v7 }
 0x25a   :  { %v592_v9 = vpop.f32.mrf.mxu0 }
 0x25b   :  { %470 = vst [vmem:[%s761_s7] sm:$0xff] %v432_v8  ;;  %v447_v10 = vadd.f32 %v592_v9, %v500_v4 }
 0x25c   :  { %v441_v11 = vpop.f32.mrf.mxu0 }
 0x25d   :  { %473 = vst [vmem:[%s761_s7 + $0x18] sm:$0xff] %v447_v10  ;;  %v442_v12 = vadd.f32 %v500_v4, %v441_v11 }
 0x25e   :  { %v595_v13 = vpop.f32.mrf.mxu0 }
 0x25f   :  { %472 = vst [vmem:[%s761_s7 + $0x10] sm:$0xff] %v442_v12  ;;  %v457_v14 = vadd.f32 %v595_v13, %v500_v4 }
 0x260   :  { %v451_v15 = vpop.f32.mrf.mxu0 }
 0x261   :  { %475 = vst [vmem:[%s761_s7 + $0x28] sm:$0xff] %v457_v14  ;;  %v452_v16 = vadd.f32 %v500_v4, %v451_v15 }
 0x262   :  { %v598_v17 = vpop.f32.mrf.mxu0 }
 0x263   :  { %474 = vst [vmem:[%s761_s7 + $0x20] sm:$0xff] %v452_v16  ;;  %v467_v18 = vadd.f32 %v598_v17, %v500_v4 }
 0x264   :  { %v461_v19 = vpop.f32.mrf.mxu0 }
 0x265   :  { %477 = vst [vmem:[%s761_s7 + $0x38] sm:$0xff] %v467_v18  ;;  %v462_v20 = vadd.f32 %v500_v4, %v461_v19 }
 0x267   :  { %476 = vst [vmem:[%s761_s7 + $0x30] sm:$0xff] %v462_v20 }

</bundles_post_ra>
